<compile_context>
chip_gen: v5e
topology: v5e:2x2
jax: 0.10.0
libtpu: 0.0.40
codegen_flags: <defaults>
</compile_context>

<pallas_src>
import math

import jax
import jax.numpy as jnp
from jax.experimental import pallas as pl
from jax.experimental.pallas import tpu as pltpu

TOTAL_STEPS = 100
TIME_EMB_DIM = 64
HIDDEN = 128  # synthetic extractor hidden width (multiple of 128 for the MXU)


# ----------------------------------------------------------------------------
# Schedules (host-side, mirrors get_schedules / __init__)
# ----------------------------------------------------------------------------
def cosine_schedules(total_steps):
    def compute_alpha_bar(t):
        return math.cos((t + 0.008) / 1.008 * math.pi / 2) ** 2

    beta = [0.0]
    alpha_bar = [0.0]
    for i in range(total_steps):
        t1 = i / total_steps
        t2 = (i + 1) / total_steps
        ab1 = compute_alpha_bar(t1)
        beta.append(min(1.0 - compute_alpha_bar(t2) / ab1, 0.999))
        alpha_bar.append(ab1)
    return (jnp.asarray(alpha_bar, jnp.float32), jnp.asarray(beta, jnp.float32))


# ----------------------------------------------------------------------------
# Sinusoidal time embeddings — plain jnp (a (B, 64) op is far below the
# per-pallas_call fixed overhead, so a dedicated kernel was pure launch cost).
# ----------------------------------------------------------------------------
def time_embeddings(dim, timesteps):
    half = dim // 2
    scale = math.log(10000.0) / (half - 1)
    freq = jnp.exp(jnp.arange(half, dtype=jnp.float32) * -scale)
    emb = timesteps.astype(jnp.float32)[:, None] * freq[None, :]
    emb = jnp.concatenate([jnp.sin(emb), jnp.cos(emb)], axis=1)
    # TODO(synk): odd `time_embedding_dim` padding branch (dim % 2 == 1) unused here.
    return emb


# ----------------------------------------------------------------------------
# Fused kernel: sample_xt + synthetic extractor, channel-major layout.
#   per (batch b, N-tile n):
#     w_eff_x = Wx + sa[b] * Wxt          # (H, C)  tiny VPU op
#     w_eff_e = sb[b] * Wxt               # (H, C)
#     h   = w_eff_x @ x + w_eff_e @ e     # == Wx@x + Wxt@xt,  (H, TN)
#     h   = tanh(h + t_proj[b])           # t_proj broadcast over N lanes
#     out = Wo @ h + bo                   # (C, TN), lane-dense store
# ----------------------------------------------------------------------------
def _fused_kernel(sa_ref, sb_ref, x_ref, e_ref, tproj_ref,
                  wx_ref, wxt_ref, wo_ref, bo_ref, o_ref):
    b = pl.program_id(0)
    sa = sa_ref[b]
    sb = sb_ref[b]

    # Fold the xt = sa*x + sb*e mixing into the first-stage weights
    # (scales an (H, C) tile instead of a (C, N) activation tile; xt is never
    #  materialized and never round-trips HBM).
    w_eff_x = wx_ref[...] + sa * wxt_ref[...]
    w_eff_e = sb * wxt_ref[...]

    h = jnp.dot(w_eff_x, x_ref[...], preferred_element_type=jnp.float32)
    h = h + jnp.dot(w_eff_e, e_ref[...], preferred_element_type=jnp.float32)
    h = jnp.tanh(h + tproj_ref[...])  # (H, TN) + (H, 1) broadcast

    o = jnp.dot(wo_ref[...], h, preferred_element_type=jnp.float32) + bo_ref[...]
    o_ref[...] = o.astype(o_ref.dtype)


def _pick_tile_n(n):
    if n <= 2048:
        return n
    for t in (2048, 1024, 512, 256, 128):
        if n % t == 0:
            return t
    return n  # fall back to a single block


def fused_extractor_pallas(x, e, tproj, sqrt_a, sqrt_1ma, params):
    B, C, N = x.shape
    H = params["wx"].shape[0]
    tile_n = _pick_tile_n(N)
    assert N % tile_n == 0
    grid = (B, N // tile_n)

    act_map = lambda b, n, sa, sb: (b, 0, n)     # x / e / out blocks
    tproj_map = lambda b, n, sa, sb: (b, 0, 0)   # per-batch time projection
    const_map = lambda b, n, sa, sb: (0, 0)      # weights / bias

    return pl.pallas_call(
        _fused_kernel,
        out_shape=jax.ShapeDtypeStruct((B, C, N), jnp.float32),
        grid_spec=pltpu.PrefetchScalarGridSpec(
            num_scalar_prefetch=2,               # sqrt_a, sqrt_1ma -> SMEM
            grid=grid,
            in_specs=[
                pl.BlockSpec((None, C, tile_n), act_map),   # x
                pl.BlockSpec((None, C, tile_n), act_map),   # e
                pl.BlockSpec((None, H, 1), tproj_map),      # t_proj
                pl.BlockSpec((H, C), const_map),            # Wx
                pl.BlockSpec((H, C), const_map),            # Wxt
                pl.BlockSpec((C, H), const_map),            # Wo
                pl.BlockSpec((C, 1), const_map),            # bo
            ],
            out_specs=pl.BlockSpec((None, C, tile_n), act_map),
        ),
        compiler_params=pltpu.CompilerParams(
            dimension_semantics=("parallel", "parallel")),
    )(sqrt_a, sqrt_1ma, x, e, tproj,
      params["wx"], params["wxt"], params["wo"], params["bo"])


# ----------------------------------------------------------------------------
# Deterministic parameter init (synthetic extractor; no checkpoint load).
# Weights stored pre-transposed for the channel-major kernel layout.
# ----------------------------------------------------------------------------
def init_params(C):
    alpha_bar, beta = cosine_schedules(TOTAL_STEPS)
    k = jax.random.PRNGKey(42)
    k1, k2, k3, k4 = jax.random.split(k, 4)
    return {
        "alpha_bar": alpha_bar,
        "beta": beta,
        "wx": 0.1 * jax.random.normal(k1, (HIDDEN, C), jnp.float32),
        "wxt": 0.1 * jax.random.normal(k2, (HIDDEN, C), jnp.float32),
        "wt": 0.1 * jax.random.normal(k3, (TIME_EMB_DIM, HIDDEN), jnp.float32),
        "wo": 0.1 * jax.random.normal(k4, (C, HIDDEN), jnp.float32),
        "bo": jnp.zeros((C, 1), jnp.float32),
    }


# ----------------------------------------------------------------------------
# Forward pass (mirrors DiffusionModel.forward)
# ----------------------------------------------------------------------------
def diffusion_forward(params, x, key):
    B, C, N = x.shape
    k_t, k_e = jax.random.split(key)

    # antithetic timestep sampling
    t_half = jax.random.randint(k_t, (B // 2 + 1,), 1, TOTAL_STEPS + 1,
                                dtype=jnp.int32)
    timesteps = jnp.concatenate([t_half, TOTAL_STEPS - t_half + 1])[:B]

    # time embeddings + hoisted time projection (tiny; plain XLA)
    time_emb = time_embeddings(TIME_EMB_DIM, timesteps)          # (B, Dt)
    tproj = (time_emb @ params["wt"])[:, :, None]                # (B, H, 1)

    # per-batch mixing scalars for xt = sqrt(a)*x + sqrt(1-a)*e
    a = params["alpha_bar"][timesteps]
    sqrt_a = jnp.sqrt(a).astype(jnp.float32)
    sqrt_1ma = jnp.sqrt(1.0 - a).astype(jnp.float32)
    e = jax.random.normal(k_e, x.shape, x.dtype)

    # fused sample_xt + extractor (single Pallas kernel, channel-major)
    out = fused_extractor_pallas(x, e, tproj, sqrt_a, sqrt_1ma, params)
    return e, out


if __name__ == "__main__":
    B, C, N = 2, 3, 256  # small point-cloud-like input [B, C, N]
    key = jax.random.PRNGKey(0)
    k_x, k_fwd = jax.random.split(key)
    x = jax.random.normal(k_x, (B, C, N), jnp.float32)

    params = init_params(C)
    fwd = jax.jit(diffusion_forward)
    e, out = fwd(params, x, k_fwd)
    jax.block_until_ready(e)
    jax.block_until_ready(out)

    assert e.shape == (B, C, N) and out.shape == (B, C, N)
    assert bool(jnp.isfinite(e).all()) and bool(jnp.isfinite(out).all())
    print("KERNEL_OK")
</pallas_src>

<mosaic_0001>
module attributes {stable_mosaic.version = 11 : i64} {
  func.func @_fused_kernel(%arg0: i32, %arg1: i32, %arg2: memref<2xf32, #tpu.memory_space<smem>>, %arg3: memref<2xf32, #tpu.memory_space<smem>>, %arg4: memref<1x3x256xf32, #tpu.memory_space<vmem>>, %arg5: memref<1x3x256xf32, #tpu.memory_space<vmem>>, %arg6: memref<1x128x1xf32, #tpu.memory_space<vmem>>, %arg7: memref<128x3xf32, #tpu.memory_space<vmem>>, %arg8: memref<128x3xf32, #tpu.memory_space<vmem>>, %arg9: memref<3x128xf32, #tpu.memory_space<vmem>>, %arg10: memref<3x1xf32, #tpu.memory_space<vmem>>, %arg11: memref<1x3x256xf32, #tpu.memory_space<vmem>>) attributes {dimension_semantics = [#tpu.dimension_semantics<parallel>, #tpu.dimension_semantics<parallel>], iteration_bounds = array<i64: 2, 1>, scalar_prefetch = 2 : i64, scratch_operands = 0 : i64, tpu.core_type = #tpu.core_type<tc>, window_params = [{transform_indices = @transform_0, window_bounds = array<i64: 1, 3, 256>}, {transform_indices = @transform_1, window_bounds = array<i64: 1, 3, 256>}, {transform_indices = @transform_2, window_bounds = array<i64: 1, 128, 1>}, {pipeline_mode = #tpu.pipeline_mode<synchronous>, transform_indices = @transform_3, window_bounds = array<i64: 128, 3>}, {pipeline_mode = #tpu.pipeline_mode<synchronous>, transform_indices = @transform_4, window_bounds = array<i64: 128, 3>}, {pipeline_mode = #tpu.pipeline_mode<synchronous>, transform_indices = @transform_5, window_bounds = array<i64: 3, 128>}, {pipeline_mode = #tpu.pipeline_mode<synchronous>, transform_indices = @transform_6, window_bounds = array<i64: 3, 1>}, {transform_indices = @transform_7, window_bounds = array<i64: 1, 3, 256>}]} {
    %0 = arith.index_cast %arg0 : i32 to index
    %1 = memref.load %arg2[%0] : memref<2xf32, #tpu.memory_space<smem>>
    %2 = arith.index_cast %arg0 : i32 to index
    %3 = memref.load %arg3[%2] : memref<2xf32, #tpu.memory_space<smem>>
    %c0 = arith.constant 0 : index
    %c0_0 = arith.constant 0 : index
    %4 = vector.load %arg7[%c0, %c0_0] : memref<128x3xf32, #tpu.memory_space<vmem>>, vector<128x3xf32>
    %c0_1 = arith.constant 0 : index
    %c0_2 = arith.constant 0 : index
    %5 = vector.load %arg8[%c0_1, %c0_2] : memref<128x3xf32, #tpu.memory_space<vmem>>, vector<128x3xf32>
    %6 = vector.broadcast %1 : f32 to vector<128x3xf32>
    %7 = arith.mulf %6, %5 : vector<128x3xf32>
    %8 = arith.addf %4, %7 : vector<128x3xf32>
    %c0_3 = arith.constant 0 : index
    %c0_4 = arith.constant 0 : index
    %9 = vector.load %arg8[%c0_3, %c0_4] : memref<128x3xf32, #tpu.memory_space<vmem>>, vector<128x3xf32>
    %10 = vector.broadcast %3 : f32 to vector<128x3xf32>
    %11 = arith.mulf %10, %9 : vector<128x3xf32>
    %c0_5 = arith.constant 0 : index
    %c0_6 = arith.constant 0 : index
    %c0_7 = arith.constant 0 : index
    %12 = vector.load %arg4[%c0_5, %c0_6, %c0_7] : memref<1x3x256xf32, #tpu.memory_space<vmem>>, vector<1x3x256xf32>
    %13 = vector.shape_cast %12 : vector<1x3x256xf32> to vector<3x256xf32>
    %cst = arith.constant dense<0.000000e+00> : vector<128x256xf32>
    %14 = tpu.matmul %8, %13, %cst {dimension_numbers = #tpu.dot_dimension_numbers<[1], [0], [0], [1], [0, 0, 1, 1], [], []>} : vector<128x3xf32>, vector<3x256xf32>, vector<128x256xf32> -> vector<128x256xf32>
    %c0_8 = arith.constant 0 : index
    %c0_9 = arith.constant 0 : index
    %c0_10 = arith.constant 0 : index
    %15 = vector.load %arg5[%c0_8, %c0_9, %c0_10] : memref<1x3x256xf32, #tpu.memory_space<vmem>>, vector<1x3x256xf32>
    %16 = vector.shape_cast %15 : vector<1x3x256xf32> to vector<3x256xf32>
    %cst_11 = arith.constant dense<0.000000e+00> : vector<128x256xf32>
    %17 = tpu.matmul %11, %16, %cst_11 {dimension_numbers = #tpu.dot_dimension_numbers<[1], [0], [0], [1], [0, 0, 1, 1], [], []>} : vector<128x3xf32>, vector<3x256xf32>, vector<128x256xf32> -> vector<128x256xf32>
    %18 = arith.addf %14, %17 : vector<128x256xf32>
    %c0_12 = arith.constant 0 : index
    %c0_13 = arith.constant 0 : index
    %c0_14 = arith.constant 0 : index
    %19 = vector.load %arg6[%c0_12, %c0_13, %c0_14] : memref<1x128x1xf32, #tpu.memory_space<vmem>>, vector<1x128x1xf32>
    %20 = vector.shape_cast %19 : vector<1x128x1xf32> to vector<128x1xf32>
    %21 = vector.broadcast %20 : vector<128x1xf32> to vector<128x256xf32>
    %22 = arith.addf %18, %21 : vector<128x256xf32>
    %23 = math.tanh %22 : vector<128x256xf32>
    %c0_15 = arith.constant 0 : index
    %c0_16 = arith.constant 0 : index
    %24 = vector.load %arg9[%c0_15, %c0_16] : memref<3x128xf32, #tpu.memory_space<vmem>>, vector<3x128xf32>
    %cst_17 = arith.constant dense<0.000000e+00> : vector<3x256xf32>
    %25 = tpu.matmul %24, %23, %cst_17 {dimension_numbers = #tpu.dot_dimension_numbers<[1], [0], [0], [1], [0, 0, 1, 1], [], []>} : vector<3x128xf32>, vector<128x256xf32>, vector<3x256xf32> -> vector<3x256xf32>
    %c0_18 = arith.constant 0 : index
    %c0_19 = arith.constant 0 : index
    %26 = vector.load %arg10[%c0_18, %c0_19] : memref<3x1xf32, #tpu.memory_space<vmem>>, vector<3x1xf32>
    %27 = vector.broadcast %26 : vector<3x1xf32> to vector<3x256xf32>
    %28 = arith.addf %25, %27 : vector<3x256xf32>
    %c0_20 = arith.constant 0 : index
    %c0_21 = arith.constant 0 : index
    %c0_22 = arith.constant 0 : index
    %29 = vector.load %arg11[%c0_20, %c0_21, %c0_22] : memref<1x3x256xf32, #tpu.memory_space<vmem>>, vector<1x3x256xf32>
    %30 = vector.shape_cast %29 : vector<1x3x256xf32> to vector<3x256xf32>
    %31 = vector.shape_cast %28 : vector<3x256xf32> to vector<1x3x256xf32>
    tpu.vector_store %arg11[%c0_20, %c0_21, %c0_22], %31 {strides = array<i32>} : memref<1x3x256xf32, #tpu.memory_space<vmem>>, vector<1x3x256xf32>,
    return
  }
  func.func @transform_0(%arg0: i32, %arg1: i32, %arg2: memref<2xf32, #tpu.memory_space<smem>>, %arg3: memref<2xf32, #tpu.memory_space<smem>>) -> (i32, i32, i32) {
    %c0_i32 = arith.constant 0 : i32
    %c0_i32_0 = arith.constant 0 : i32
    return %arg0, %c0_i32, %arg1 : i32, i32, i32
  }
  func.func @transform_1(%arg0: i32, %arg1: i32, %arg2: memref<2xf32, #tpu.memory_space<smem>>, %arg3: memref<2xf32, #tpu.memory_space<smem>>) -> (i32, i32, i32) {
    %c0_i32 = arith.constant 0 : i32
    %c0_i32_0 = arith.constant 0 : i32
    return %arg0, %c0_i32, %arg1 : i32, i32, i32
  }
  func.func @transform_2(%arg0: i32, %arg1: i32, %arg2: memref<2xf32, #tpu.memory_space<smem>>, %arg3: memref<2xf32, #tpu.memory_space<smem>>) -> (i32, i32, i32) {
    %c0_i32 = arith.constant 0 : i32
    %c0_i32_0 = arith.constant 0 : i32
    %c0_i32_1 = arith.constant 0 : i32
    return %arg0, %c0_i32, %c0_i32_0 : i32, i32, i32
  }
  func.func @transform_3(%arg0: i32, %arg1: i32, %arg2: memref<2xf32, #tpu.memory_space<smem>>, %arg3: memref<2xf32, #tpu.memory_space<smem>>) -> (i32, i32) {
    %c0_i32 = arith.constant 0 : i32
    %c0_i32_0 = arith.constant 0 : i32
    %c0_i32_1 = arith.constant 0 : i32
    return %c0_i32, %c0_i32_0 : i32, i32
  }
  func.func @transform_4(%arg0: i32, %arg1: i32, %arg2: memref<2xf32, #tpu.memory_space<smem>>, %arg3: memref<2xf32, #tpu.memory_space<smem>>) -> (i32, i32) {
    %c0_i32 = arith.constant 0 : i32
    %c0_i32_0 = arith.constant 0 : i32
    %c0_i32_1 = arith.constant 0 : i32
    return %c0_i32, %c0_i32_0 : i32, i32
  }
  func.func @transform_5(%arg0: i32, %arg1: i32, %arg2: memref<2xf32, #tpu.memory_space<smem>>, %arg3: memref<2xf32, #tpu.memory_space<smem>>) -> (i32, i32) {
    %c0_i32 = arith.constant 0 : i32
    %c0_i32_0 = arith.constant 0 : i32
    %c0_i32_1 = arith.constant 0 : i32
    return %c0_i32, %c0_i32_0 : i32, i32
  }
  func.func @transform_6(%arg0: i32, %arg1: i32, %arg2: memref<2xf32, #tpu.memory_space<smem>>, %arg3: memref<2xf32, #tpu.memory_space<smem>>) -> (i32, i32) {
    %c0_i32 = arith.constant 0 : i32
    %c0_i32_0 = arith.constant 0 : i32
    %c0_i32_1 = arith.constant 0 : i32
    return %c0_i32, %c0_i32_0 : i32, i32
  }
  func.func @transform_7(%arg0: i32, %arg1: i32, %arg2: memref<2xf32, #tpu.memory_space<smem>>, %arg3: memref<2xf32, #tpu.memory_space<smem>>) -> (i32, i32, i32) {
    %c0_i32 = arith.constant 0 : i32
    %c0_i32_0 = arith.constant 0 : i32
    return %arg0, %c0_i32, %arg1 : i32, i32, i32
  }
}

</mosaic_0001>

<bundles_post_ra>
// kernel: diffusion_forward.21
= control target key start
LH: loop header
LB: loop body
LE: loop exit
PB: predicated region body
PF: predicated region fallthrough
CT: control target
= control target key end

     0   :  { %s1411_s15 = smov [#allocation3]   ;;  %s1412_s16 = smov [#allocation4]   ;;  %s1798_s0 = inlined_call_operand.vmem [shape: f32[2], index: 0, kind: input, shape index: {}]   ;;  %s1799_s2 = inlined_call_operand.vmem [shape: f32[2,3,256], index: 2, kind: input, shape index: {}]   ;;  %s1800_s3 = inlined_call_operand.vmem [shape: f32[2,3,256], index: 3, kind: input, shape index: {}]   ;;  %s1801_s4 = inlined_call_operand.vmem [shape: f32[2,128,1], index: 4, kind: input, shape index: {}]   ;;  %s1802_s5 = inlined_call_operand.vmem [shape: f32[128,3], index: 5, kind: input, shape index: {}]   ;;  %s1803_s6 = inlined_call_operand.vmem [shape: f32[128,3], index: 6, kind: input, shape index: {}]   ;;  %s1804_s7 = inlined_call_operand.vmem [shape: f32[3,128], index: 7, kind: input, shape index: {}]   ;;  %s1805_s8 = inlined_call_operand.vmem [shape: f32[3,1], index: 8, kind: input, shape index: {}]   ;;  %s1806_s9 = inlined_call_operand.vmem [shape: f32[2,3,256], index: 9, kind: output, shape index: {}]   ;;  %s1807_s1 = inlined_call_operand.vmem [shape: f32[2], index: 1, kind: input, shape index: {}]  }
   0x1   :  { %s15_s11 = sshll.u32 %s1798_s0, 4  ;;  %s20_s14 = sshll.u32 %s1807_s1, 4  ;;  %s16_s11 = int_to_ptr.vmem [resolvable:$true] %s15_s11  ;;  %s21_s14 = int_to_ptr.vmem [resolvable:$true] %s20_s14 }
   0x2   :  { %18 = dma.vmem_to_smem %s16_s11, 16, %s1411_s15, [#allocation2] }
   0x3   :  { %23 = dma.vmem_to_smem %s21_s14, 16, %s1412_s16, [#allocation2] }
   0x4   :  { %1397 = dma.done.wait [#allocation2], 32 }
   0x5   :  { %1398 = vsyncadd [#allocation2], 4294967264 }
   0x6   :  { %26 = sfence }
   0x7   :  { %s1470_s17 = smov 0   ;;  %s1472_s18 = smov 0  }
   0x8   :  { %s1474_s19 = smov 0  }
   0x9 LB: > { %s44_s0 = sadd.s32 1, %s1405_s18  ;;  %p1184_p0 = scmp.ge.s32.totalorder %s1409_s19, 1  ;;  %s1409_s19 = sphi %s1474_s19, %s32_s19   ;;  %s1405_s18 = sphi %s1472_s18, %s1821_s18   ;;  %s1401_s17 = sphi %s1470_s17, %s1820_s17  }
   0xa   : > { %p46_p1 = scmp.ge.s32.totalorder %s44_s0, 2  ;;  %p300_p2 = scmp.lt.s32.totalorder %s1409_s19, 3 }
   0xc   : > { %s1823_s0 = smov (%p46_p1, %s44_s0), 0  ;;  %p301_p3 = pnand %p1184_p0, %p300_p2 }
   0xe   : > { %304 = sbr.rel (%p301_p3) target bundleno = 470 (0x1d6), region = 48 }
  0x13   : > { %p355_p4 = scmp.lt.s32.totalorder %s1401_s17, 1  ;;  %v1413_v0 = vmov 0   ;;  %s390_s1 = sld [smem:[#allocation4 + %s1401_s17]]  ;;  %v407_v7 = vld [vmem:[%s1803_s6] sm:$0xff]  ;;  %vm528_vm0 = vcmask 1042432   ;;  %vm479_vm1 = vcmask 23552  }
  0x14   : > { %1294 = vset.pattern.permute.xlu0 %v1413_v0  ;;  %1295 = vset.pattern.permute.xlu1 %v1413_v0  ;;  %s389_s29 = sld [smem:[#allocation3 + %s1401_s17]]  ;;  %v391_v16 = vld [vmem:[%s1802_s5] sm:$0xff]  ;;  %v408_v19 = vld [vmem:[%s1803_s6 + $0x8] sm:$0xff]  ;;  %v409_v29 = vld [vmem:[%s1803_s6 + $0x10] sm:$0xff]  ;;  %vm1059_vm2 = vcmask 1043456  }
  0x15   : > { %s356_s20 = scalar_select %p355_p4, %s1401_s17, 1  ;;  %1296 = vset.pattern.permute.xlu2 %v1413_v0  ;;  %v392_v26 = vld [vmem:[%s1802_s5 + $0x8] sm:$0xff]  ;;  %v393_v34 = vld [vmem:[%s1802_s5 + $0x10] sm:$0xff]  ;;  %v410_v37 = vld [vmem:[%s1803_s6 + $0x18] sm:$0xff] }
  0x16   : > { %v394_v42 = vld [vmem:[%s1802_s5 + $0x18] sm:$0xff]  ;;  %v411_v45 = vld [vmem:[%s1803_s6 + $0x20] sm:$0xff]  ;;  %v412_v50 = vld [vmem:[%s1803_s6 + $0x28] sm:$0xff] }
  0x17   : > { %s1265_s21 = sshll.u32 %s356_s20, 7  ;;  %s1488_s22 = sshll.u32 %s356_s20, 3  ;;  %v395_v48 = vld [vmem:[%s1802_s5 + $0x20] sm:$0xff]  ;;  %v396_v53 = vld [vmem:[%s1802_s5 + $0x28] sm:$0xff]  ;;  %v413_v55 = vld [vmem:[%s1803_s6 + $0x30] sm:$0xff] }
  0x18   : > { %s1493_s25 = scalar_lea.vmem %s1801_s4, %s1265_s21  ;;  %s372_s28 = scalar_lea.vmem %s1800_s3, %s1488_s22  ;;  %v397_v58 = vld [vmem:[%s1802_s5 + $0x30] sm:$0xff]  ;;  %v414_v60 = vld [vmem:[%s1803_s6 + $0x38] sm:$0xff] }
  0x19   : > { %v864_v1 = vld [vmem:[%s1493_s25 + $0x78] sm:$0xff]  ;;  %v474_v2 = vld [vmem:[%s372_s28] sm:$0x77]  ;;  %v862_v3 = vld [vmem:[%s1493_s25 + $0x68] sm:$0xff]  ;;  %s362_s11 = scalar_lea.vmem %s1799_s2, %s1488_s22  ;;  %v1506_v5 = vstv %s390_s1  ;;  %s387_s28 = scalar_lea.vmem %s1806_s9, %s1488_s22 }
  0x1a   : > { %942 = vperm.xlu0 %1294, %v864_v1   ;;  %476 = vst [vmem:[#allocation1] ss:$2 sm:$0xff] %v474_v2  ;;  %932 = vperm.xlu1 %1295, %v862_v3   ;;  %v860_v4 = vld [vmem:[%s1493_s25 + $0x58] sm:$0xff]  ;;  %v863_v6 = vld [vmem:[%s1493_s25 + $0x70] sm:$0xff]  ;;  %v473_v8 = vld [vmem:[%s362_s11] sm:$0x77]  ;;  %v457_v9 = vmul.f32 %v1506_v5, %v407_v7  ;;  %v1513_v10 = vstv %s389_s29  ;;  %v458_v20 = vmul.f32 %v1506_v5, %v408_v19 }
  0x1b   : > { %922 = vperm.xlu2 %1296, %v860_v4   ;;  %v861_v11 = vld [vmem:[%s1493_s25 + $0x60] sm:$0xff]  ;;  %v424_v14 = vmul.f32 %v1513_v10, %v407_v7  ;;  %v859_v15 = vld [vmem:[%s1493_s25 + $0x50] sm:$0xff]  ;;  %v858_v17 = vld [vmem:[%s1493_s25 + $0x48] sm:$0xff]  ;;  %v425_v24 = vmul.f32 %v1513_v10, %v408_v19  ;;  %v459_v30 = vmul.f32 %v1506_v5, %v409_v29  ;;  %v426_v32 = vmul.f32 %v1513_v10, %v409_v29 }
  0x1c   : > { %v857_v23 = vld [vmem:[%s1493_s25 + $0x40] sm:$0xff]  ;;  %v856_v25 = vld [vmem:[%s1493_s25 + $0x38] sm:$0xff]  ;;  %v855_v27 = vld [vmem:[%s1493_s25 + $0x30] sm:$0xff]  ;;  %v460_v38 = vmul.f32 %v1506_v5, %v410_v37  ;;  %v427_v40 = vmul.f32 %v1513_v10, %v410_v37  ;;  %v461_v46 = vmul.f32 %v1506_v5, %v411_v45  ;;  %v428_v47 = vmul.f32 %v1513_v10, %v411_v45 }
  0x1d   : > { %v440_v18 = vadd.f32 %v424_v14, %v391_v16  ;;  %v441_v28 = vadd.f32 %v425_v24, %v392_v26  ;;  %v854_v31 = vld [vmem:[%s1493_s25 + $0x28] sm:$0xff]  ;;  %v853_v33 = vld [vmem:[%s1493_s25 + $0x20] sm:$0xff]  ;;  %v852_v35 = vld [vmem:[%s1493_s25 + $0x18] sm:$0xff]  ;;  %v442_v36 = vadd.f32 %v426_v32, %v393_v34  ;;  %v462_v51 = vmul.f32 %v1506_v5, %v412_v50 }
  0x1e   : > { %v851_v39 = vld [vmem:[%s1493_s25 + $0x10] sm:$0xff]  ;;  %v850_v41 = vld [vmem:[%s1493_s25 + $0x8] sm:$0xff]  ;;  %v849_v43 = vld [vmem:[%s1493_s25] sm:$0xff]  ;;  %v443_v44 = vadd.f32 %v427_v40, %v394_v42  ;;  %v444_v49 = vadd.f32 %v428_v47, %v395_v48  ;;  %v429_v52 = vmul.f32 %v1513_v10, %v412_v50  ;;  %v463_v56 = vmul.f32 %v1506_v5, %v413_v55 }
  0x1f   : > { %v430_v57 = vmul.f32 %v1513_v10, %v413_v55  ;;  %v464_v61 = vmul.f32 %v1506_v5, %v414_v60  ;;  %v431_v62 = vmul.f32 %v1513_v10, %v414_v60  ;;  %v398_v63 = vld [vmem:[%s1802_s5 + $0x38] sm:$0xff]  ;;  %v415_v1 = vld [vmem:[%s1803_s6 + $0x40] sm:$0xff]  ;;  %v416_v7 = vld [vmem:[%s1803_s6 + $0x48] sm:$0xff] }
  0x20   : > { %v445_v54 = vadd.f32 %v429_v52, %v396_v53  ;;  %v465_v2 = vmul.f32 %v1506_v5, %v415_v1  ;;  %v432_v3 = vmul.f32 %v1513_v10, %v415_v1  ;;  %v399_v4 = vld [vmem:[%s1802_s5 + $0x40] sm:$0xff]  ;;  %v401_v16 = vld [vmem:[%s1802_s5 + $0x50] sm:$0xff]  ;;  %v406_v42 = vld [vmem:[%s1802_s5 + $0x78] sm:$0xff] }
  0x21   : > { %v477_v12 = vld.sshfl [vmem:[#allocation1] sm:$0xff pattern:$0x75316420]  ;;  %v478_v13 = vld.sshfl [vmem:[#allocation1 + $0x8] sm:$0xff pattern:$0x75316420]  ;;  %v446_v59 = vadd.f32 %v430_v57, %v397_v58  ;;  %v447_v0 = vadd.f32 %v431_v62, %v398_v63 }
  0x22   : > { %937 = vperm.xlu0 %1294, %v863_v6   ;;  %664 = vst [vmem:[#allocation1] ss:$2 sm:$0xff] %v473_v8  ;;  %1193 = vmatpush.msk.msra.mxu0 %vm528_vm0, %v477_v12  ;;  %v448_v6 = vadd.f32 %v432_v3, %v399_v4  ;;  %v466_v8 = vmul.f32 %v1506_v5, %v416_v7  ;;  %v403_v26 = vld [vmem:[%s1802_s5 + $0x60] sm:$0xff]  ;;  %v405_v37 = vld [vmem:[%s1802_s5 + $0x70] sm:$0xff] }
  0x23   : > { %1210 = vmatpush.msk.msra.mxu1 %vm528_vm0, %v478_v13  ;;  %1194 = vmatmul.msk.f32.vlgmr.msra.gmra.mxu0 %vm479_vm1, %v457_v9  ;;  %v417_v13 = vld [vmem:[%s1803_s6 + $0x50] sm:$0xff] }
  0x24   : > { %1211 = vmatmul.msk.f32.vlgmr.msra.gmra.mxu1 %vm479_vm1, %v457_v9  ;;  %927 = vperm.xlu1 %1295, %v861_v11   ;;  %v433_v9 = vmul.f32 %v1513_v10, %v416_v7  ;;  %v400_v11 = vld [vmem:[%s1802_s5 + $0x48] sm:$0xff]  ;;  %v467_v14 = vmul.f32 %v1506_v5, %v417_v13 }
  0x25   : > { %917 = vperm.xlu2 %1296, %v859_v15   ;;  %v434_v15 = vmul.f32 %v1513_v10, %v417_v13 }
  0x26   : > { %v449_v12 = vadd.f32 %v433_v9, %v400_v11 }
  0x29   : > { %v665_v21 = vld.sshfl [vmem:[#allocation1] sm:$0xff pattern:$0x75316420]  ;;  %v666_v22 = vld.sshfl [vmem:[#allocation1 + $0x8] sm:$0xff pattern:$0x75316420] }
  0x2a   : > { %912 = vperm.xlu0 %1294, %v858_v17   ;;  %1227 = vmatpush.msk.msra.mxu2 %vm528_vm0, %v665_v21  ;;  %v450_v17 = vadd.f32 %v434_v15, %v401_v16  ;;  %v402_v21 = vld [vmem:[%s1802_s5 + $0x58] sm:$0xff] }
  0x2b   : > { %1244 = vmatpush.msk.msra.mxu3 %vm528_vm0, %v666_v22  ;;  %1228 = vmatmul.msk.f32.vlgmr.msra.gmra.mxu2 %vm479_vm1, %v440_v18 }
  0x2c   : > { %1245 = vmatmul.msk.f32.vlgmr.msra.gmra.mxu3 %vm479_vm1, %v440_v18  ;;  %1195 = vmatmul.msk.f32.gmra.mxu0 %vm479_vm1, %v458_v20  ;;  %v418_v18 = vld [vmem:[%s1803_s6 + $0x58] sm:$0xff] }
  0x2d   : > { %1212 = vmatmul.msk.f32.gmra.mxu1 %vm479_vm1, %v458_v20  ;;  %907 = vperm.xlu1 %1295, %v857_v23   ;;  %v468_v19 = vmul.f32 %v1506_v5, %v418_v18  ;;  %v435_v20 = vmul.f32 %v1513_v10, %v418_v18  ;;  %v419_v23 = vld [vmem:[%s1803_s6 + $0x60] sm:$0xff] }
  0x2e   : > { %902 = vperm.xlu2 %1296, %v856_v25   ;;  %v469_v24 = vmul.f32 %v1506_v5, %v419_v23  ;;  %v436_v25 = vmul.f32 %v1513_v10, %v419_v23 }
  0x2f   : > { %v451_v22 = vadd.f32 %v435_v20, %v402_v21 }
  0x32   : > { %897 = vperm.xlu0 %1294, %v855_v27   ;;  %v452_v27 = vadd.f32 %v436_v25, %v403_v26 }
  0x33   : > { %1229 = vmatmul.msk.f32.gmra.mxu2 %vm479_vm1, %v441_v28 }
  0x34   : > { %1246 = vmatmul.msk.f32.gmra.mxu3 %vm479_vm1, %v441_v28  ;;  %1196 = vmatmul.msk.f32.gmra.mxu0 %vm479_vm1, %v459_v30  ;;  %v420_v28 = vld [vmem:[%s1803_s6 + $0x68] sm:$0xff] }
  0x35   : > { %1213 = vmatmul.msk.f32.gmra.mxu1 %vm479_vm1, %v459_v30  ;;  %892 = vperm.xlu1 %1295, %v854_v31   ;;  %v470_v29 = vmul.f32 %v1506_v5, %v420_v28  ;;  %v437_v30 = vmul.f32 %v1513_v10, %v420_v28  ;;  %v404_v31 = vld [vmem:[%s1802_s5 + $0x68] sm:$0xff] }
  0x36   : > { %887 = vperm.xlu2 %1296, %v853_v33   ;;  %v421_v33 = vld [vmem:[%s1803_s6 + $0x70] sm:$0xff] }
  0x37   : > { %v453_v32 = vadd.f32 %v437_v30, %v404_v31  ;;  %v471_v34 = vmul.f32 %v1506_v5, %v421_v33 }
  0x3a   : > { %882 = vperm.xlu0 %1294, %v852_v35   ;;  %v1010_v35 = vld [vmem:[%s1805_s8] sm:$0x7] }
  0x3b   : > { %1230 = vmatmul.msk.f32.gmra.mxu2 %vm479_vm1, %v442_v36 }
  0x3c   : > { %1247 = vmatmul.msk.f32.gmra.mxu3 %vm479_vm1, %v442_v36  ;;  %1197 = vmatmul.msk.f32.gmra.mxu0 %vm479_vm1, %v460_v38  ;;  %v438_v36 = vmul.f32 %v1513_v10, %v421_v33 }
  0x3d   : > { %1214 = vmatmul.msk.f32.gmra.mxu1 %vm479_vm1, %v460_v38  ;;  %877 = vperm.xlu1 %1295, %v851_v39   ;;  %v422_v39 = vld [vmem:[%s1803_s6 + $0x78] sm:$0xff] }
  0x3e   : > { %872 = vperm.xlu2 %1296, %v850_v41   ;;  %v454_v38 = vadd.f32 %v438_v36, %v405_v37  ;;  %v472_v40 = vmul.f32 %v1506_v5, %v422_v39  ;;  %v439_v41 = vmul.f32 %v1513_v10, %v422_v39 }
  0x42   : > { %867 = vperm.xlu0 %1294, %v849_v43   ;;  %v455_v43 = vadd.f32 %v439_v41, %v406_v42 }
  0x43   : > { %1231 = vmatmul.msk.f32.gmra.mxu2 %vm479_vm1, %v443_v44 }
  0x44   : > { %1248 = vmatmul.msk.f32.gmra.mxu3 %vm479_vm1, %v443_v44  ;;  %1198 = vmatmul.msk.f32.gmra.mxu0 %vm479_vm1, %v461_v46 }
  0x45   : > { %1215 = vmatmul.msk.f32.gmra.mxu1 %vm479_vm1, %v461_v46  ;;  %1013 = vperm.xlu1 %1295, %v1010_v35  }
  0x4b   : > { %1232 = vmatmul.msk.f32.gmra.mxu2 %vm479_vm1, %v444_v49 }
  0x4c   : > { %1249 = vmatmul.msk.f32.gmra.mxu3 %vm479_vm1, %v444_v49  ;;  %1199 = vmatmul.msk.f32.gmra.mxu0 %vm479_vm1, %v462_v51 }
  0x4d   : > { %1216 = vmatmul.msk.f32.gmra.mxu1 %vm479_vm1, %v462_v51 }
  0x53   : > { %1233 = vmatmul.msk.f32.gmra.mxu2 %vm479_vm1, %v445_v54 }
  0x54   : > { %1250 = vmatmul.msk.f32.gmra.mxu3 %vm479_vm1, %v445_v54  ;;  %1200 = vmatmul.msk.f32.gmra.mxu0 %vm479_vm1, %v463_v56 }
  0x55   : > { %1217 = vmatmul.msk.f32.gmra.mxu1 %vm479_vm1, %v463_v56 }
  0x5b   : > { %1234 = vmatmul.msk.f32.gmra.mxu2 %vm479_vm1, %v446_v59 }
  0x5c   : > { %1251 = vmatmul.msk.f32.gmra.mxu3 %vm479_vm1, %v446_v59  ;;  %1201 = vmatmul.msk.f32.gmra.mxu0 %vm479_vm1, %v464_v61 }
  0x5d   : > { %1218 = vmatmul.msk.f32.gmra.mxu1 %vm479_vm1, %v464_v61 }
  0x63   : > { %1235 = vmatmul.msk.f32.gmra.mxu2 %vm479_vm1, %v447_v0 }
  0x64   : > { %1252 = vmatmul.msk.f32.gmra.mxu3 %vm479_vm1, %v447_v0  ;;  %1202 = vmatmul.msk.f32.gmra.mxu0 %vm479_vm1, %v465_v2 }
  0x65   : > { %1219 = vmatmul.msk.f32.gmra.mxu1 %vm479_vm1, %v465_v2 }
  0x6b   : > { %1236 = vmatmul.msk.f32.gmra.mxu2 %vm479_vm1, %v448_v6 }
  0x6c   : > { %1253 = vmatmul.msk.f32.gmra.mxu3 %vm479_vm1, %v448_v6  ;;  %1203 = vmatmul.msk.f32.gmra.mxu0 %vm479_vm1, %v466_v8 }
  0x6d   : > { %1220 = vmatmul.msk.f32.gmra.mxu1 %vm479_vm1, %v466_v8 }
  0x73   : > { %1237 = vmatmul.msk.f32.gmra.mxu2 %vm479_vm1, %v449_v12 }
  0x74   : > { %1254 = vmatmul.msk.f32.gmra.mxu3 %vm479_vm1, %v449_v12  ;;  %1204 = vmatmul.msk.f32.gmra.mxu0 %vm479_vm1, %v467_v14 }
  0x75   : > { %1221 = vmatmul.msk.f32.gmra.mxu1 %vm479_vm1, %v467_v14 }
  0x7b   : > { %1238 = vmatmul.msk.f32.gmra.mxu2 %vm479_vm1, %v450_v17 }
  0x7c   : > { %1255 = vmatmul.msk.f32.gmra.mxu3 %vm479_vm1, %v450_v17  ;;  %1205 = vmatmul.msk.f32.gmra.mxu0 %vm479_vm1, %v468_v19 }
  0x7d   : > { %1222 = vmatmul.msk.f32.gmra.mxu1 %vm479_vm1, %v468_v19 }
  0x83   : > { %1239 = vmatmul.msk.f32.gmra.mxu2 %vm479_vm1, %v451_v22 }
  0x84   : > { %1256 = vmatmul.msk.f32.gmra.mxu3 %vm479_vm1, %v451_v22  ;;  %1206 = vmatmul.msk.f32.gmra.mxu0 %vm479_vm1, %v469_v24 }
  0x85   : > { %1223 = vmatmul.msk.f32.gmra.mxu1 %vm479_vm1, %v469_v24 }
  0x8b   : > { %1240 = vmatmul.msk.f32.gmra.mxu2 %vm479_vm1, %v452_v27 }
  0x8c   : > { %1257 = vmatmul.msk.f32.gmra.mxu3 %vm479_vm1, %v452_v27  ;;  %1207 = vmatmul.msk.f32.gmra.mxu0 %vm479_vm1, %v470_v29 }
  0x8d   : > { %1224 = vmatmul.msk.f32.gmra.mxu1 %vm479_vm1, %v470_v29 }
  0x93   : > { %1241 = vmatmul.msk.f32.gmra.mxu2 %vm479_vm1, %v453_v32 }
  0x94   : > { %1258 = vmatmul.msk.f32.gmra.mxu3 %vm479_vm1, %v453_v32  ;;  %1208 = vmatmul.msk.f32.gmra.mxu0 %vm479_vm1, %v471_v34 }
  0x95   : > { %1225 = vmatmul.msk.f32.gmra.mxu1 %vm479_vm1, %v471_v34 }
  0x9b   : > { %1242 = vmatmul.msk.f32.gmra.mxu2 %vm479_vm1, %v454_v38 }
  0x9c   : > { %1259 = vmatmul.msk.f32.gmra.mxu3 %vm479_vm1, %v454_v38  ;;  %1209 = vmatmul.msk.f32.gmra.mxu0 %vm479_vm1, %v472_v40 }
  0x9d   : > { %1226 = vmatmul.msk.f32.gmra.mxu1 %vm479_vm1, %v472_v40 }
  0xa0   : > { %v550_v44 = vpop.f32.mrf.mxu0 }
  0xa1   : > { %v615_v45 = vpop.f32.mrf.mxu1 }
  0xa3   : > { %1243 = vmatmul.msk.f32.gmra.mxu2 %vm479_vm1, %v455_v43 }
  0xa4   : > { %1260 = vmatmul.msk.f32.gmra.mxu3 %vm479_vm1, %v455_v43 }
  0xa9   : > { %v553_v5 = vpop.f32.mrf.mxu0 }
  0xaa   : > { %v618_v46 = vpop.f32.mrf.mxu1 }
  0xae   : > { %v736_v47 = vpop.f32.mrf.mxu2 }
  0xaf   : > { %v801_v48 = vpop.f32.mrf.mxu3  ;;  %v1722_v10 = vadd.f32 %v736_v47, %v550_v44 }
  0xb0   : > { %v1724_v49 = vadd.f32 %v801_v48, %v615_v45 }
  0xb1   : > { %1808 = vst [vmem:[#allocation6_spill] sm:$0xff] %v1722_v10  ;;  %v556_v50 = vpop.f32.mrf.mxu0 }
  0xb2   : > { %1809 = vst [vmem:[#allocation7_spill] sm:$0xff] %v1724_v49  ;;  %v621_v51 = vpop.f32.mrf.mxu1 }
  0xb6   : > { %v739_v52 = vpop.f32.mrf.mxu2 }
  0xb7   : > { %v804_v53 = vpop.f32.mrf.mxu3  ;;  %v1726_v54 = vadd.f32 %v739_v52, %v553_v5 }
  0xb8   : > { %v1728_v55 = vadd.f32 %v804_v53, %v618_v46 }
  0xb9   : > { %1810 = vst [vmem:[#allocation8_spill] sm:$0xff] %v1726_v54  ;;  %v559_v56 = vpop.f32.mrf.mxu0 }
  0xba   : > { %1811 = vst [vmem:[#allocation9_spill] sm:$0xff] %v1728_v55  ;;  %v624_v57 = vpop.f32.mrf.mxu1 }
  0xbe   : > { %v742_v58 = vpop.f32.mrf.mxu2 }
  0xbf   : > { %v807_v59 = vpop.f32.mrf.mxu3  ;;  %v1730_v60 = vadd.f32 %v742_v58, %v556_v50  ;;  %v943_v50 = vpop.permute.xlu0 %942 }
  0xc0   : > { %v1732_v61 = vadd.f32 %v807_v59, %v621_v51  ;;  %v923_v59 = vpop.permute.xlu2 %922 }
  0xc1   : > { %1812 = vst [vmem:[#allocation10_spill] sm:$0xff] %v1730_v60  ;;  %v562_v62 = vpop.f32.mrf.mxu0 }
  0xc2   : > { %1813 = vst [vmem:[#allocation11_spill] sm:$0xff] %v1732_v61  ;;  %v627_v63 = vpop.f32.mrf.mxu1 }
  0xc6   : > { %v745_v0 = vpop.f32.mrf.mxu2 }
  0xc7   : > { %v810_v1 = vpop.f32.mrf.mxu3  ;;  %v1734_v2 = vadd.f32 %v745_v0, %v559_v56  ;;  %v938_v58 = vpop.permute.xlu0 %937 }
  0xc8   : > { %v1736_v3 = vadd.f32 %v810_v1, %v624_v57  ;;  %v933_v57 = vpop.permute.xlu1 %932 }
  0xc9   : > { %v565_v4 = vpop.f32.mrf.mxu0 }
  0xca   : > { %v630_v6 = vpop.f32.mrf.mxu1 }
  0xce   : > { %v748_v7 = vpop.f32.mrf.mxu2 }
  0xcf   : > { %v813_v8 = vpop.f32.mrf.mxu3  ;;  %v1738_v9 = vadd.f32 %v748_v7, %v562_v62  ;;  %v918_v7 = vpop.permute.xlu2 %917 }
  0xd0   : > { %v1740_v11 = vadd.f32 %v813_v8, %v627_v63 }
  0xd1   : > { %v568_v12 = vpop.f32.mrf.mxu0 }
  0xd2   : > { %v633_v13 = vpop.f32.mrf.mxu1 }
  0xd6   : > { %v751_v14 = vpop.f32.mrf.mxu2 }
  0xd7   : > { %v816_v15 = vpop.f32.mrf.mxu3  ;;  %v1742_v16 = vadd.f32 %v751_v14, %v565_v4  ;;  %v928_v4 = vpop.permute.xlu1 %927 }
  0xd8   : > { %v1744_v17 = vadd.f32 %v816_v15, %v630_v6  ;;  %v913_v6 = vpop.permute.xlu0 %912 }
  0xd9   : > { %v571_v18 = vpop.f32.mrf.mxu0 }
  0xda   : > { %v636_v19 = vpop.f32.mrf.mxu1 }
  0xde   : > { %v754_v20 = vpop.f32.mrf.mxu2 }
  0xdf   : > { %v819_v21 = vpop.f32.mrf.mxu3  ;;  %v1746_v22 = vadd.f32 %v754_v20, %v568_v12  ;;  %v908_v10 = vpop.permute.xlu1 %907 }
  0xe0   : > { %v1748_v23 = vadd.f32 %v819_v21, %v633_v13 }
  0xe1   : > { %v574_v24 = vpop.f32.mrf.mxu0 }
  0xe2   : > { %v639_v25 = vpop.f32.mrf.mxu1 }
  0xe6   : > { %v757_v26 = vpop.f32.mrf.mxu2 }
  0xe7   : > { %v822_v27 = vpop.f32.mrf.mxu3  ;;  %v1750_v28 = vadd.f32 %v757_v26, %v571_v18 }
  0xe8   : > { %v1752_v29 = vadd.f32 %v822_v27, %v636_v19 }
  0xe9   : > { %v1754_v30 = vpop.f32.mrf.mxu0 }
  0xea   : > { %v1756_v31 = vpop.f32.mrf.mxu1 }
  0xee   : > { %v760_v32 = vpop.f32.mrf.mxu2 }
  0xef   : > { %v825_v33 = vpop.f32.mrf.mxu3  ;;  %v1758_v34 = vadd.f32 %v760_v32, %v574_v24 }
  0xf0   : > { %v1760_v35 = vadd.f32 %v825_v33, %v639_v25 }
  0xf1   : > { %v580_v36 = vpop.f32.mrf.mxu0 }
  0xf2   : > { %v645_v37 = vpop.f32.mrf.mxu1 }
  0xf6   : > { %v763_v38 = vpop.f32.mrf.mxu2 }
  0xf7   : > { %v828_v39 = vpop.f32.mrf.mxu3 }
  0xf9   : > { %v583_v40 = vpop.f32.mrf.mxu0 }
  0xfa   : > { %v648_v41 = vpop.f32.mrf.mxu1 }
  0xfe   : > { %v766_v42 = vpop.f32.mrf.mxu2 }
  0xff   : > { %v831_v43 = vpop.f32.mrf.mxu3 }
 0x101   : > { %v586_v44 = vpop.f32.mrf.mxu0 }
 0x102   : > { %v651_v45 = vpop.f32.mrf.mxu1 }
 0x106   : > { %v769_v5 = vpop.f32.mrf.mxu2 }
 0x107   : > { %v834_v46 = vpop.f32.mrf.mxu3  ;;  %v770_v55 = vadd.f32 %v769_v5, %v583_v40 }
 0x108   : > { %v835_v61 = vadd.f32 %v834_v46, %v648_v41 }
 0x109   : > { %v589_v51 = vpop.f32.mrf.mxu0 }
 0x10a   : > { %v654_v52 = vpop.f32.mrf.mxu1  ;;  %v968_v40 = vadd.f32 %v923_v59, %v835_v61  ;;  %v961_v61 = vadd.f32 %v908_v10, %v1758_v34 }
 0x10e   : > { %v772_v47 = vpop.f32.mrf.mxu2 }
 0x10f   : > { %v837_v48 = vpop.f32.mrf.mxu3  ;;  %v773_v25 = vadd.f32 %v772_v47, %v586_v44  ;;  %v764_v44 = vadd.f32 %v763_v38, %v1754_v30  ;;  %v967_v47 = vadd.f32 %v923_v59, %v770_v55  ;;  %v893_v55 = vpop.permute.xlu1 %892  ;;  %v962_v30 = vadd.f32 %v908_v10, %v1760_v35 }
 0x110   : > { %v838_v33 = vadd.f32 %v837_v48, %v651_v45  ;;  %v829_v45 = vadd.f32 %v828_v39, %v1756_v31 }
 0x111   : > { %v592_v62 = vpop.f32.mrf.mxu0 }
 0x112   : > { %v657_v63 = vpop.f32.mrf.mxu1 }
 0x116   : > { %v775_v53 = vpop.f32.mrf.mxu2 }
 0x117   : > { %v840_v56 = vpop.f32.mrf.mxu3  ;;  %v776_v19 = vadd.f32 %v775_v53, %v589_v51  ;;  %v898_v51 = vpop.permute.xlu0 %897  ;;  %v832_v53 = vadd.f32 %v831_v43, %v645_v37  ;;  %v964_v37 = vadd.f32 %v913_v6, %v829_v45 }
 0x118   : > { %v841_v24 = vadd.f32 %v840_v56, %v654_v52  ;;  %v970_v52 = vadd.f32 %v928_v4, %v838_v33  ;;  %v958_v35 = vadd.f32 %v898_v51, %v1748_v23 }
 0x119   : > { %v595_v8 = vpop.f32.mrf.mxu0  ;;  %v971_v54 = vadd.f32 %v933_v57, %v776_v19  ;;  %v966_v48 = vadd.f32 %v918_v7, %v832_v53 }
 0x11a   : > { %v660_v12 = vpop.f32.mrf.mxu1  ;;  %v972_v60 = vadd.f32 %v933_v57, %v841_v24  ;;  %v957_v57 = vadd.f32 %v898_v51, %v1746_v22  ;;  %v1817_v24 = vld [vmem:[#allocation9_spill] sm:$0xff] }
 0x11e   : > { %v778_v0 = vpop.f32.mrf.mxu2 }
 0x11f   : > { %v843_v1 = vpop.f32.mrf.mxu3  ;;  %v779_v13 = vadd.f32 %v778_v0, %v592_v62  ;;  %v903_v62 = vpop.permute.xlu2 %902  ;;  %v969_v0 = vadd.f32 %v928_v4, %v773_v25 }
 0x120   : > { %v844_v14 = vadd.f32 %v843_v1, %v657_v63  ;;  %v767_v63 = vadd.f32 %v766_v42, %v580_v36  ;;  %v963_v42 = vadd.f32 %v913_v6, %v764_v44  ;;  %v959_v39 = vadd.f32 %v903_v62, %v1750_v28 }
 0x121   : > { %v973_v26 = vadd.f32 %v938_v58, %v779_v13  ;;  %v960_v56 = vadd.f32 %v903_v62, %v1752_v29  ;;  %v955_v28 = vadd.f32 %v893_v55, %v1742_v16  ;;  %v956_v29 = vadd.f32 %v893_v55, %v1744_v17  ;;  %v1814_v13 = vld [vmem:[#allocation10_spill] sm:$0xff]  ;;  %v1819_v62 = vld [vmem:[#allocation7_spill] sm:$0xff] }
 0x122   : > { %v974_v49 = vadd.f32 %v938_v58, %v844_v14  ;;  %v965_v41 = vadd.f32 %v918_v7, %v767_v63  ;;  %v878_v7 = vpop.permute.xlu1 %877 }
 0x123   : > { %v949_v14 = vadd.f32 %v878_v7, %v1814_v13 }
 0x126   : > { %v781_v15 = vpop.f32.mrf.mxu2 }
 0x127   : > { %v846_v18 = vpop.f32.mrf.mxu3  ;;  %v782_v20 = vadd.f32 %v781_v15, %v595_v8  ;;  %v888_v38 = vpop.permute.xlu2 %887 }
 0x128   : > { %v847_v21 = vadd.f32 %v846_v18, %v660_v12  ;;  %v953_v22 = vadd.f32 %v888_v38, %v1738_v9  ;;  %v954_v23 = vadd.f32 %v888_v38, %v1740_v11  ;;  %v1815_v18 = vld [vmem:[#allocation11_spill] sm:$0xff] }
 0x129   : > { %v975_v27 = vadd.f32 %v943_v50, %v782_v20  ;;  %v950_v19 = vadd.f32 %v878_v7, %v1815_v18  ;;  %v1816_v20 = vld [vmem:[#allocation8_spill] sm:$0xff] }
 0x12a   : > { %v976_v32 = vadd.f32 %v943_v50, %v847_v21  ;;  %v883_v50 = vpop.permute.xlu0 %882 }
 0x12b   : > { %1297 = vtanh.f32 %v975_v27  ;;  %v951_v16 = vadd.f32 %v883_v50, %v1734_v2  ;;  %v952_v17 = vadd.f32 %v883_v50, %v1736_v3  ;;  %v1818_v27 = vld [vmem:[#allocation6_spill] sm:$0xff] }
 0x12c   : > { %1299 = vtanh.f32 %v976_v32 }
 0x12d   : > { %1301 = vtanh.f32 %v973_v26 }
 0x12e   : > { %1303 = vtanh.f32 %v974_v49 }
 0x12f   : > { %1305 = vtanh.f32 %v971_v54  ;;  %v873_v9 = vpop.permute.xlu2 %872 }
 0x130   : > { %1307 = vtanh.f32 %v972_v60  ;;  %v947_v21 = vadd.f32 %v873_v9, %v1816_v20  ;;  %v948_v25 = vadd.f32 %v873_v9, %v1817_v24 }
 0x131   : > { %v1298_v5 = vpop.eup %1297  ;;  %1309 = vtanh.f32 %v969_v0 }
 0x132   : > { %v1300_v46 = vpop.eup %1299  ;;  %1311 = vtanh.f32 %v970_v52  ;;  %1016 = vmatpush.msrb.mxu0 %v1298_v5  ;;  %v868_v15 = vpop.permute.xlu0 %867  ;;  %v1009_v5 = vld [vmem:[%s1804_s7] sm:$0x7] }
 0x133   : > { %v1302_v36 = vpop.eup %1301  ;;  %1313 = vtanh.f32 %v967_v47  ;;  %1036 = vmatpush.msrb.mxu1 %v1300_v46  ;;  %v945_v32 = vadd.f32 %v868_v15, %v1818_v27  ;;  %v946_v63 = vadd.f32 %v868_v15, %v1819_v62 }
 0x134   : > { %v1304_v49 = vpop.eup %1303  ;;  %1315 = vtanh.f32 %v968_v40  ;;  %1017 = vmatpush.msrb.mxu0 %v1302_v36 }
 0x135   : > { %v1306_v54 = vpop.eup %1305  ;;  %1317 = vtanh.f32 %v965_v41  ;;  %1037 = vmatpush.msrb.mxu1 %v1304_v49 }
 0x136   : > { %v1308_v60 = vpop.eup %1307  ;;  %1319 = vtanh.f32 %v966_v48  ;;  %1018 = vmatpush.msrb.mxu0 %v1306_v54  ;;  %v1014_v48 = vpop.permute.xlu1 %1013 }
 0x137   : > { %v1310_v31 = vpop.eup %1309  ;;  %1321 = vtanh.f32 %v963_v42  ;;  %1038 = vmatpush.msrb.mxu1 %v1308_v60 }
 0x138   : > { %v1312_v43 = vpop.eup %1311  ;;  %1323 = vtanh.f32 %v964_v37  ;;  %1019 = vmatpush.msrb.mxu0 %v1310_v31 }
 0x139   : > { %v1314_v34 = vpop.eup %1313  ;;  %1325 = vtanh.f32 %v961_v61  ;;  %1039 = vmatpush.msrb.mxu1 %v1312_v43 }
 0x13a   : > { %v1316_v10 = vpop.eup %1315  ;;  %1327 = vtanh.f32 %v962_v30  ;;  %1020 = vmatpush.msrb.mxu0 %v1314_v34 }
 0x13b   : > { %v1318_v58 = vpop.eup %1317  ;;  %1329 = vtanh.f32 %v959_v39  ;;  %1040 = vmatpush.msrb.mxu1 %v1316_v10 }
 0x13c   : > { %v1320_v59 = vpop.eup %1319  ;;  %1331 = vtanh.f32 %v960_v56  ;;  %1021 = vmatpush.msrb.mxu0 %v1318_v58 }
 0x13d   : > { %v1322_v1 = vpop.eup %1321  ;;  %1333 = vtanh.f32 %v957_v57  ;;  %1041 = vmatpush.msrb.mxu1 %v1320_v59 }
 0x13e   : > { %v1324_v4 = vpop.eup %1323  ;;  %1335 = vtanh.f32 %v958_v35  ;;  %1022 = vmatpush.msrb.mxu0 %v1322_v1 }
 0x13f   : > { %v1326_v6 = vpop.eup %1325  ;;  %1337 = vtanh.f32 %v955_v28  ;;  %1042 = vmatpush.msrb.mxu1 %v1324_v4 }
 0x140   : > { %v1328_v8 = vpop.eup %1327  ;;  %1339 = vtanh.f32 %v956_v29  ;;  %1023 = vmatpush.msrb.mxu0 %v1326_v6 }
 0x141   : > { %v1330_v12 = vpop.eup %1329  ;;  %1341 = vtanh.f32 %v953_v22  ;;  %1043 = vmatpush.msrb.mxu1 %v1328_v8 }
 0x142   : > { %v1332_v11 = vpop.eup %1331  ;;  %1343 = vtanh.f32 %v954_v23  ;;  %1024 = vmatpush.msrb.mxu0 %v1330_v12 }
 0x143   : > { %v1334_v2 = vpop.eup %1333  ;;  %1345 = vtanh.f32 %v951_v16  ;;  %1044 = vmatpush.msrb.mxu1 %v1332_v11 }
 0x144   : > { %v1336_v3 = vpop.eup %1335  ;;  %1347 = vtanh.f32 %v952_v17  ;;  %1025 = vmatpush.msrb.mxu0 %v1334_v2 }
 0x145   : > { %v1338_v26 = vpop.eup %1337  ;;  %1349 = vtanh.f32 %v949_v14  ;;  %1045 = vmatpush.msrb.mxu1 %v1336_v3 }
 0x146   : > { %v1340_v33 = vpop.eup %1339  ;;  %1351 = vtanh.f32 %v950_v19  ;;  %1026 = vmatpush.msrb.mxu0 %v1338_v26 }
 0x147   : > { %v1342_v0 = vpop.eup %1341  ;;  %1353 = vtanh.f32 %v947_v21  ;;  %1046 = vmatpush.msrb.mxu1 %v1340_v33 }
 0x148   : > { %v1344_v51 = vpop.eup %1343  ;;  %1355 = vtanh.f32 %v948_v25  ;;  %1027 = vmatpush.msrb.mxu0 %v1342_v0 }
 0x149   : > { %v1346_v53 = vpop.eup %1345  ;;  %1357 = vtanh.f32 %v945_v32  ;;  %1047 = vmatpush.msrb.mxu1 %v1344_v51 }
 0x14a   : > { %v1348_v52 = vpop.eup %1347  ;;  %1359 = vtanh.f32 %v946_v63  ;;  %1028 = vmatpush.msrb.mxu0 %v1346_v53 }
 0x14b   : > { %v1350_v44 = vpop.eup %1349  ;;  %1048 = vmatpush.msrb.mxu1 %v1348_v52 }
 0x14c   : > { %v1352_v47 = vpop.eup %1351  ;;  %1029 = vmatpush.msrb.mxu0 %v1350_v44 }
 0x14d   : > { %v1354_v45 = vpop.eup %1353  ;;  %1049 = vmatpush.msrb.mxu1 %v1352_v47 }
 0x14e   : > { %v1356_v40 = vpop.eup %1355  ;;  %1030 = vmatpush.msrb.mxu0 %v1354_v45 }
 0x14f   : > { %v1358_v41 = vpop.eup %1357  ;;  %1050 = vmatpush.msrb.mxu1 %v1356_v40 }
 0x150   : > { %v1360_v46 = vpop.eup %1359  ;;  %1031 = vmatpush.msrb.mxu0 %v1358_v41 }
 0x151   : > { %1051 = vmatpush.msrb.mxu1 %v1360_v46  ;;  %1032 = vmatmul.f32.vlgmr.msrb.gmra.mxu0 %v1009_v5 }
 0x152   : > { %1052 = vmatmul.f32.vlgmr.msrb.gmra.mxu1 %v1009_v5 }
 0x1ce   : > { %v1033_v36 = vpop.f32.mrf.mxu0 }
 0x1cf   : > { %v1053_v42 = vpop.f32.mrf.mxu1  ;;  %v1034_v37 = vadd.f32 %v1033_v36, %v1014_v48 }
 0x1d0   : > { %v1054_v49 = vadd.f32 %v1053_v42, %v1014_v48 }
 0x1d2   : > { %v1058_v54 = vrot.slane %v1054_v49, 4 }
 0x1d4   : > { %v1060_v55 = vsel %vm1059_vm2, %v1034_v37, %v1058_v54 }
 0x1d5   : > { %1062 = vst [vmem:[%s387_s28] sm:$0x77] %v1060_v55 }
 0x1d6 PF: > { %s32_s19 = sadd.s32 1, %s1409_s19   ;;  %s1820_s17 = smov %s1405_s18 }
 0x1d7   : > { %p29_p5 = scmp.ge.s32.totalorder %s32_s19, 4   ;;  %s1821_s18 = smov %s1823_s0 }
 0x1d9   :  { %31 = sbr.rel (!%p29_p5) target bundleno = 9 (0x9), region = 84 }

</bundles_post_ra>
